<compile_context>
chip_gen: v7x
topology: tpu7x:2x2x1
jax: 0.10.0
libtpu: 0.0.40
codegen_flags: <defaults>
</compile_context>

<pallas_src>
import functools

import jax
import jax.numpy as jnp
from jax.experimental import pallas as pl
from jax.experimental.pallas import tpu as pltpu

EPS = 1e-5
F_PAD = 128          # lane-dense padded feature width for every layer
N_LAYERS = 5
BIAS_ROW = F_PAD     # sublane row of the fused bias inside each layer's slab
SLAB_ROWS = F_PAD + 8  # 128 weight rows + 8 padding rows (bias in row 128)


def qnet_kernel(x_ref, wb_ref, out_ref):
    h = x_ref[...]                                   # (B, 128) f32
    for i in range(N_LAYERS):                        # static unroll (5 layers)
        # BatchNorm1d, training mode: batch mean / biased batch var, one pass.
        mu = jnp.mean(h, axis=0, keepdims=True)
        var = jnp.maximum(jnp.mean(h * h, axis=0, keepdims=True) - mu * mu, 0.0)
        hn = ((h - mu) * jax.lax.rsqrt(var + EPS)).astype(jnp.bfloat16)
        # Linear on the MXU (gamma folded into W, beta folded into the bias).
        w = wb_ref[i, :F_PAD, :]                                   # (128,128) bf16
        b = wb_ref[i, BIAS_ROW:BIAS_ROW + 1, :].astype(jnp.float32)  # (1,128)
        h = jnp.dot(hn, w, preferred_element_type=jnp.float32) + b
        if i < N_LAYERS - 1:
            h = jnp.maximum(h, 0.0)                  # ReLU
    out_ref[...] = h


def pack_params(params, obs_len, hidden_size, actions_n):
    """Pack 20 small tensors into one zero-padded, lane-dense bf16 slab.

    Done once per model (not per call).  Rows 0..127 of slab[i] hold the
    gamma-scaled weight (in, out); row 128 holds the fused bias beta@W + b.
    """
    in_dims = [obs_len] + [hidden_size] * 4
    out_dims = [hidden_size] * 4 + [actions_n]
    slab = jnp.zeros((N_LAYERS, SLAB_ROWS, F_PAD), jnp.float32)
    for i in range(N_LAYERS):
        g, be, w, b = params[4 * i:4 * i + 4]   # (1,in),(1,in),(in,out),(1,out)
        w_g = w * g[0][:, None]                 # fold gamma into the weights
        b_fused = be @ w + b                    # fold beta into the bias
        slab = slab.at[i, :in_dims[i], :out_dims[i]].set(w_g)
        slab = slab.at[i, BIAS_ROW, :out_dims[i]].set(b_fused[0])
    return slab.astype(jnp.bfloat16)


@functools.partial(jax.jit, static_argnames=("actions_n",))
def _qnet_forward_jit(x, wb_slab, *, actions_n):
    B, obs_len = x.shape
    x_pad = jnp.zeros((B, F_PAD), jnp.float32).at[:, :obs_len].set(x)
    cost = pl.CostEstimate(
        flops=2 * N_LAYERS * B * F_PAD * F_PAD,
        transcendentals=N_LAYERS * F_PAD,
        bytes_accessed=x_pad.size * 4 + wb_slab.size * 2 + B * F_PAD * 4,
    )
    out_pad = pl.pallas_call(
        qnet_kernel,
        out_shape=jax.ShapeDtypeStruct((B, F_PAD), jnp.float32),
        in_specs=[pl.BlockSpec(memory_space=pltpu.MemorySpace.VMEM)] * 2,
        out_specs=pl.BlockSpec(memory_space=pltpu.MemorySpace.VMEM),
        cost_estimate=cost,
    )(x_pad, wb_slab)
    return out_pad[:, :actions_n]


def q_network_forward(x, wb_slab, actions_n):
    """x: (B, obs_len) f32; wb_slab: packed params from pack_params()."""
    return _qnet_forward_jit(x, wb_slab, actions_n=actions_n)


def make_params(key, obs_len, hidden_size, actions_n):
    """Deterministic synthetic init (PyTorch-like scaling for Linear)."""
    dims = [(obs_len, hidden_size), (hidden_size, hidden_size),
            (hidden_size, hidden_size), (hidden_size, hidden_size),
            (hidden_size, actions_n)]
    params = []
    for (fan_in, fan_out) in dims:
        key, kg, kb, kw, kbi = jax.random.split(key, 5)
        gamma = 1.0 + 0.1 * jax.random.normal(kg, (1, fan_in), jnp.float32)
        beta = 0.1 * jax.random.normal(kb, (1, fan_in), jnp.float32)
        bound = 1.0 / jnp.sqrt(jnp.float32(fan_in))
        w = jax.random.uniform(kw, (fan_in, fan_out), jnp.float32,
                               minval=-bound, maxval=bound)
        b = jax.random.uniform(kbi, (1, fan_out), jnp.float32,
                               minval=-bound, maxval=bound)
        params += [gamma, beta, w, b]
    return params


def q_network_reference(x, params):
    """Pure-JAX f32 reference (unfused, two-pass variance)."""
    h = x
    for i in range(N_LAYERS):
        g, be, w, b = params[4 * i:4 * i + 4]
        mu = jnp.mean(h, axis=0, keepdims=True)
        var = jnp.mean((h - mu) ** 2, axis=0, keepdims=True)
        hn = (h - mu) / jnp.sqrt(var + EPS) * g + be
        h = hn @ w + b
        if i < N_LAYERS - 1:
            h = jnp.maximum(h, 0.0)
    return h


if __name__ == "__main__":
    B, obs_len, hidden_size, actions_n = 8, 16, 30, 4

    key = jax.random.PRNGKey(0)
    kx, kp = jax.random.split(key)
    x = jax.random.normal(kx, (B, obs_len), jnp.float32)
    params = make_params(kp, obs_len, hidden_size, actions_n)

    # Pack once per model (outside the hot path), then call the jitted forward.
    wb_slab = pack_params(params, obs_len, hidden_size, actions_n)

    out = q_network_forward(x, wb_slab, actions_n)
    out = jax.block_until_ready(out)

    ref = q_network_reference(x, params)
    assert out.shape == (B, actions_n)
    # bf16 MXU operands => loosened tolerance vs. the f32 reference.
    assert jnp.allclose(out, ref, atol=5e-2, rtol=5e-2), "mismatch vs reference"

    print("KERNEL_OK")
</pallas_src>

<mosaic_0001>
module attributes {stable_mosaic.version = 11 : i64} {
  func.func @qnet_kernel(%arg0: memref<8x128xf32, #tpu.memory_space<vmem>>, %arg1: memref<5x136x128xbf16, #tpu.memory_space<vmem>>, %arg2: memref<8x128xf32, #tpu.memory_space<vmem>>) attributes {dimension_semantics = [], scalar_prefetch = 0 : i64, scratch_operands = 0 : i64, tpu.core_type = #tpu.core_type<tc>} {
    %c0 = arith.constant 0 : index
    %c0_0 = arith.constant 0 : index
    %0 = vector.load %arg0[%c0, %c0_0] : memref<8x128xf32, #tpu.memory_space<vmem>>, vector<8x128xf32>
    %cst = arith.constant dense<0.000000e+00> : vector<128xf32>
    %1 = vector.multi_reduction <add>, %0, %cst [0] : vector<8x128xf32> to vector<128xf32>
    %2 = vector.shape_cast %1 : vector<128xf32> to vector<1x128xf32>
    %cst_1 = arith.constant 8.000000e+00 : f32
    %3 = vector.broadcast %cst_1 : f32 to vector<1x128xf32>
    %4 = arith.divf %2, %3 : vector<1x128xf32>
    %5 = arith.mulf %0, %0 : vector<8x128xf32>
    %cst_2 = arith.constant dense<0.000000e+00> : vector<128xf32>
    %6 = vector.multi_reduction <add>, %5, %cst_2 [0] : vector<8x128xf32> to vector<128xf32>
    %7 = vector.shape_cast %6 : vector<128xf32> to vector<1x128xf32>
    %cst_3 = arith.constant 8.000000e+00 : f32
    %8 = vector.broadcast %cst_3 : f32 to vector<1x128xf32>
    %9 = arith.divf %7, %8 : vector<1x128xf32>
    %10 = arith.mulf %4, %4 : vector<1x128xf32>
    %11 = arith.subf %9, %10 : vector<1x128xf32>
    %cst_4 = arith.constant 0.000000e+00 : f32
    %12 = vector.broadcast %cst_4 : f32 to vector<1x128xf32>
    %13 = arith.maximumf %11, %12 : vector<1x128xf32>
    %14 = vector.broadcast %4 : vector<1x128xf32> to vector<8x128xf32>
    %15 = arith.subf %0, %14 : vector<8x128xf32>
    %cst_5 = arith.constant 9.99999974E-6 : f32
    %16 = vector.broadcast %cst_5 : f32 to vector<1x128xf32>
    %17 = arith.addf %13, %16 : vector<1x128xf32>
    %18 = math.rsqrt %17 : vector<1x128xf32>
    %19 = vector.broadcast %18 : vector<1x128xf32> to vector<8x128xf32>
    %20 = arith.mulf %15, %19 : vector<8x128xf32>
    %21 = arith.truncf %20 : vector<8x128xf32> to vector<8x128xbf16>
    %c0_6 = arith.constant 0 : index
    %c0_7 = arith.constant 0 : index
    %c0_8 = arith.constant 0 : index
    %22 = vector.load %arg1[%c0_6, %c0_7, %c0_8] : memref<5x136x128xbf16, #tpu.memory_space<vmem>>, vector<1x128x128xbf16>
    %23 = vector.shape_cast %22 : vector<1x128x128xbf16> to vector<128x128xbf16>
    %c0_9 = arith.constant 0 : index
    %c128 = arith.constant 128 : index
    %c0_10 = arith.constant 0 : index
    %24 = vector.load %arg1[%c0_9, %c128, %c0_10] : memref<5x136x128xbf16, #tpu.memory_space<vmem>>, vector<1x1x128xbf16>
    %25 = vector.shape_cast %24 : vector<1x1x128xbf16> to vector<1x128xbf16>
    %26 = arith.extf %25 : vector<1x128xbf16> to vector<1x128xf32>
    %cst_11 = arith.constant dense<0.000000e+00> : vector<8x128xf32>
    %27 = tpu.matmul %21, %23, %cst_11 {dimension_numbers = #tpu.dot_dimension_numbers<[1], [0], [0], [1], [0, 0, 1, 1], [], []>} : vector<8x128xbf16>, vector<128x128xbf16>, vector<8x128xf32> -> vector<8x128xf32>
    %28 = vector.broadcast %26 : vector<1x128xf32> to vector<8x128xf32>
    %29 = arith.addf %27, %28 : vector<8x128xf32>
    %cst_12 = arith.constant 0.000000e+00 : f32
    %30 = vector.broadcast %cst_12 : f32 to vector<8x128xf32>
    %31 = arith.maximumf %29, %30 : vector<8x128xf32>
    %cst_13 = arith.constant dense<0.000000e+00> : vector<128xf32>
    %32 = vector.multi_reduction <add>, %31, %cst_13 [0] : vector<8x128xf32> to vector<128xf32>
    %33 = vector.shape_cast %32 : vector<128xf32> to vector<1x128xf32>
    %cst_14 = arith.constant 8.000000e+00 : f32
    %34 = vector.broadcast %cst_14 : f32 to vector<1x128xf32>
    %35 = arith.divf %33, %34 : vector<1x128xf32>
    %36 = arith.mulf %31, %31 : vector<8x128xf32>
    %cst_15 = arith.constant dense<0.000000e+00> : vector<128xf32>
    %37 = vector.multi_reduction <add>, %36, %cst_15 [0] : vector<8x128xf32> to vector<128xf32>
    %38 = vector.shape_cast %37 : vector<128xf32> to vector<1x128xf32>
    %cst_16 = arith.constant 8.000000e+00 : f32
    %39 = vector.broadcast %cst_16 : f32 to vector<1x128xf32>
    %40 = arith.divf %38, %39 : vector<1x128xf32>
    %41 = arith.mulf %35, %35 : vector<1x128xf32>
    %42 = arith.subf %40, %41 : vector<1x128xf32>
    %cst_17 = arith.constant 0.000000e+00 : f32
    %43 = vector.broadcast %cst_17 : f32 to vector<1x128xf32>
    %44 = arith.maximumf %42, %43 : vector<1x128xf32>
    %45 = vector.broadcast %35 : vector<1x128xf32> to vector<8x128xf32>
    %46 = arith.subf %31, %45 : vector<8x128xf32>
    %cst_18 = arith.constant 9.99999974E-6 : f32
    %47 = vector.broadcast %cst_18 : f32 to vector<1x128xf32>
    %48 = arith.addf %44, %47 : vector<1x128xf32>
    %49 = math.rsqrt %48 : vector<1x128xf32>
    %50 = vector.broadcast %49 : vector<1x128xf32> to vector<8x128xf32>
    %51 = arith.mulf %46, %50 : vector<8x128xf32>
    %52 = arith.truncf %51 : vector<8x128xf32> to vector<8x128xbf16>
    %c1 = arith.constant 1 : index
    %c0_19 = arith.constant 0 : index
    %c0_20 = arith.constant 0 : index
    %53 = vector.load %arg1[%c1, %c0_19, %c0_20] : memref<5x136x128xbf16, #tpu.memory_space<vmem>>, vector<1x128x128xbf16>
    %54 = vector.shape_cast %53 : vector<1x128x128xbf16> to vector<128x128xbf16>
    %c1_21 = arith.constant 1 : index
    %c128_22 = arith.constant 128 : index
    %c0_23 = arith.constant 0 : index
    %55 = vector.load %arg1[%c1_21, %c128_22, %c0_23] : memref<5x136x128xbf16, #tpu.memory_space<vmem>>, vector<1x1x128xbf16>
    %56 = vector.shape_cast %55 : vector<1x1x128xbf16> to vector<1x128xbf16>
    %57 = arith.extf %56 : vector<1x128xbf16> to vector<1x128xf32>
    %cst_24 = arith.constant dense<0.000000e+00> : vector<8x128xf32>
    %58 = tpu.matmul %52, %54, %cst_24 {dimension_numbers = #tpu.dot_dimension_numbers<[1], [0], [0], [1], [0, 0, 1, 1], [], []>} : vector<8x128xbf16>, vector<128x128xbf16>, vector<8x128xf32> -> vector<8x128xf32>
    %59 = vector.broadcast %57 : vector<1x128xf32> to vector<8x128xf32>
    %60 = arith.addf %58, %59 : vector<8x128xf32>
    %cst_25 = arith.constant 0.000000e+00 : f32
    %61 = vector.broadcast %cst_25 : f32 to vector<8x128xf32>
    %62 = arith.maximumf %60, %61 : vector<8x128xf32>
    %cst_26 = arith.constant dense<0.000000e+00> : vector<128xf32>
    %63 = vector.multi_reduction <add>, %62, %cst_26 [0] : vector<8x128xf32> to vector<128xf32>
    %64 = vector.shape_cast %63 : vector<128xf32> to vector<1x128xf32>
    %cst_27 = arith.constant 8.000000e+00 : f32
    %65 = vector.broadcast %cst_27 : f32 to vector<1x128xf32>
    %66 = arith.divf %64, %65 : vector<1x128xf32>
    %67 = arith.mulf %62, %62 : vector<8x128xf32>
    %cst_28 = arith.constant dense<0.000000e+00> : vector<128xf32>
    %68 = vector.multi_reduction <add>, %67, %cst_28 [0] : vector<8x128xf32> to vector<128xf32>
    %69 = vector.shape_cast %68 : vector<128xf32> to vector<1x128xf32>
    %cst_29 = arith.constant 8.000000e+00 : f32
    %70 = vector.broadcast %cst_29 : f32 to vector<1x128xf32>
    %71 = arith.divf %69, %70 : vector<1x128xf32>
    %72 = arith.mulf %66, %66 : vector<1x128xf32>
    %73 = arith.subf %71, %72 : vector<1x128xf32>
    %cst_30 = arith.constant 0.000000e+00 : f32
    %74 = vector.broadcast %cst_30 : f32 to vector<1x128xf32>
    %75 = arith.maximumf %73, %74 : vector<1x128xf32>
    %76 = vector.broadcast %66 : vector<1x128xf32> to vector<8x128xf32>
    %77 = arith.subf %62, %76 : vector<8x128xf32>
    %cst_31 = arith.constant 9.99999974E-6 : f32
    %78 = vector.broadcast %cst_31 : f32 to vector<1x128xf32>
    %79 = arith.addf %75, %78 : vector<1x128xf32>
    %80 = math.rsqrt %79 : vector<1x128xf32>
    %81 = vector.broadcast %80 : vector<1x128xf32> to vector<8x128xf32>
    %82 = arith.mulf %77, %81 : vector<8x128xf32>
    %83 = arith.truncf %82 : vector<8x128xf32> to vector<8x128xbf16>
    %c2 = arith.constant 2 : index
    %c0_32 = arith.constant 0 : index
    %c0_33 = arith.constant 0 : index
    %84 = vector.load %arg1[%c2, %c0_32, %c0_33] : memref<5x136x128xbf16, #tpu.memory_space<vmem>>, vector<1x128x128xbf16>
    %85 = vector.shape_cast %84 : vector<1x128x128xbf16> to vector<128x128xbf16>
    %c2_34 = arith.constant 2 : index
    %c128_35 = arith.constant 128 : index
    %c0_36 = arith.constant 0 : index
    %86 = vector.load %arg1[%c2_34, %c128_35, %c0_36] : memref<5x136x128xbf16, #tpu.memory_space<vmem>>, vector<1x1x128xbf16>
    %87 = vector.shape_cast %86 : vector<1x1x128xbf16> to vector<1x128xbf16>
    %88 = arith.extf %87 : vector<1x128xbf16> to vector<1x128xf32>
    %cst_37 = arith.constant dense<0.000000e+00> : vector<8x128xf32>
    %89 = tpu.matmul %83, %85, %cst_37 {dimension_numbers = #tpu.dot_dimension_numbers<[1], [0], [0], [1], [0, 0, 1, 1], [], []>} : vector<8x128xbf16>, vector<128x128xbf16>, vector<8x128xf32> -> vector<8x128xf32>
    %90 = vector.broadcast %88 : vector<1x128xf32> to vector<8x128xf32>
    %91 = arith.addf %89, %90 : vector<8x128xf32>
    %cst_38 = arith.constant 0.000000e+00 : f32
    %92 = vector.broadcast %cst_38 : f32 to vector<8x128xf32>
    %93 = arith.maximumf %91, %92 : vector<8x128xf32>
    %cst_39 = arith.constant dense<0.000000e+00> : vector<128xf32>
    %94 = vector.multi_reduction <add>, %93, %cst_39 [0] : vector<8x128xf32> to vector<128xf32>
    %95 = vector.shape_cast %94 : vector<128xf32> to vector<1x128xf32>
    %cst_40 = arith.constant 8.000000e+00 : f32
    %96 = vector.broadcast %cst_40 : f32 to vector<1x128xf32>
    %97 = arith.divf %95, %96 : vector<1x128xf32>
    %98 = arith.mulf %93, %93 : vector<8x128xf32>
    %cst_41 = arith.constant dense<0.000000e+00> : vector<128xf32>
    %99 = vector.multi_reduction <add>, %98, %cst_41 [0] : vector<8x128xf32> to vector<128xf32>
    %100 = vector.shape_cast %99 : vector<128xf32> to vector<1x128xf32>
    %cst_42 = arith.constant 8.000000e+00 : f32
    %101 = vector.broadcast %cst_42 : f32 to vector<1x128xf32>
    %102 = arith.divf %100, %101 : vector<1x128xf32>
    %103 = arith.mulf %97, %97 : vector<1x128xf32>
    %104 = arith.subf %102, %103 : vector<1x128xf32>
    %cst_43 = arith.constant 0.000000e+00 : f32
    %105 = vector.broadcast %cst_43 : f32 to vector<1x128xf32>
    %106 = arith.maximumf %104, %105 : vector<1x128xf32>
    %107 = vector.broadcast %97 : vector<1x128xf32> to vector<8x128xf32>
    %108 = arith.subf %93, %107 : vector<8x128xf32>
    %cst_44 = arith.constant 9.99999974E-6 : f32
    %109 = vector.broadcast %cst_44 : f32 to vector<1x128xf32>
    %110 = arith.addf %106, %109 : vector<1x128xf32>
    %111 = math.rsqrt %110 : vector<1x128xf32>
    %112 = vector.broadcast %111 : vector<1x128xf32> to vector<8x128xf32>
    %113 = arith.mulf %108, %112 : vector<8x128xf32>
    %114 = arith.truncf %113 : vector<8x128xf32> to vector<8x128xbf16>
    %c3 = arith.constant 3 : index
    %c0_45 = arith.constant 0 : index
    %c0_46 = arith.constant 0 : index
    %115 = vector.load %arg1[%c3, %c0_45, %c0_46] : memref<5x136x128xbf16, #tpu.memory_space<vmem>>, vector<1x128x128xbf16>
    %116 = vector.shape_cast %115 : vector<1x128x128xbf16> to vector<128x128xbf16>
    %c3_47 = arith.constant 3 : index
    %c128_48 = arith.constant 128 : index
    %c0_49 = arith.constant 0 : index
    %117 = vector.load %arg1[%c3_47, %c128_48, %c0_49] : memref<5x136x128xbf16, #tpu.memory_space<vmem>>, vector<1x1x128xbf16>
    %118 = vector.shape_cast %117 : vector<1x1x128xbf16> to vector<1x128xbf16>
    %119 = arith.extf %118 : vector<1x128xbf16> to vector<1x128xf32>
    %cst_50 = arith.constant dense<0.000000e+00> : vector<8x128xf32>
    %120 = tpu.matmul %114, %116, %cst_50 {dimension_numbers = #tpu.dot_dimension_numbers<[1], [0], [0], [1], [0, 0, 1, 1], [], []>} : vector<8x128xbf16>, vector<128x128xbf16>, vector<8x128xf32> -> vector<8x128xf32>
    %121 = vector.broadcast %119 : vector<1x128xf32> to vector<8x128xf32>
    %122 = arith.addf %120, %121 : vector<8x128xf32>
    %cst_51 = arith.constant 0.000000e+00 : f32
    %123 = vector.broadcast %cst_51 : f32 to vector<8x128xf32>
    %124 = arith.maximumf %122, %123 : vector<8x128xf32>
    %cst_52 = arith.constant dense<0.000000e+00> : vector<128xf32>
    %125 = vector.multi_reduction <add>, %124, %cst_52 [0] : vector<8x128xf32> to vector<128xf32>
    %126 = vector.shape_cast %125 : vector<128xf32> to vector<1x128xf32>
    %cst_53 = arith.constant 8.000000e+00 : f32
    %127 = vector.broadcast %cst_53 : f32 to vector<1x128xf32>
    %128 = arith.divf %126, %127 : vector<1x128xf32>
    %129 = arith.mulf %124, %124 : vector<8x128xf32>
    %cst_54 = arith.constant dense<0.000000e+00> : vector<128xf32>
    %130 = vector.multi_reduction <add>, %129, %cst_54 [0] : vector<8x128xf32> to vector<128xf32>
    %131 = vector.shape_cast %130 : vector<128xf32> to vector<1x128xf32>
    %cst_55 = arith.constant 8.000000e+00 : f32
    %132 = vector.broadcast %cst_55 : f32 to vector<1x128xf32>
    %133 = arith.divf %131, %132 : vector<1x128xf32>
    %134 = arith.mulf %128, %128 : vector<1x128xf32>
    %135 = arith.subf %133, %134 : vector<1x128xf32>
    %cst_56 = arith.constant 0.000000e+00 : f32
    %136 = vector.broadcast %cst_56 : f32 to vector<1x128xf32>
    %137 = arith.maximumf %135, %136 : vector<1x128xf32>
    %138 = vector.broadcast %128 : vector<1x128xf32> to vector<8x128xf32>
    %139 = arith.subf %124, %138 : vector<8x128xf32>
    %cst_57 = arith.constant 9.99999974E-6 : f32
    %140 = vector.broadcast %cst_57 : f32 to vector<1x128xf32>
    %141 = arith.addf %137, %140 : vector<1x128xf32>
    %142 = math.rsqrt %141 : vector<1x128xf32>
    %143 = vector.broadcast %142 : vector<1x128xf32> to vector<8x128xf32>
    %144 = arith.mulf %139, %143 : vector<8x128xf32>
    %145 = arith.truncf %144 : vector<8x128xf32> to vector<8x128xbf16>
    %c4 = arith.constant 4 : index
    %c0_58 = arith.constant 0 : index
    %c0_59 = arith.constant 0 : index
    %146 = vector.load %arg1[%c4, %c0_58, %c0_59] : memref<5x136x128xbf16, #tpu.memory_space<vmem>>, vector<1x128x128xbf16>
    %147 = vector.shape_cast %146 : vector<1x128x128xbf16> to vector<128x128xbf16>
    %c4_60 = arith.constant 4 : index
    %c128_61 = arith.constant 128 : index
    %c0_62 = arith.constant 0 : index
    %148 = vector.load %arg1[%c4_60, %c128_61, %c0_62] : memref<5x136x128xbf16, #tpu.memory_space<vmem>>, vector<1x1x128xbf16>
    %149 = vector.shape_cast %148 : vector<1x1x128xbf16> to vector<1x128xbf16>
    %150 = arith.extf %149 : vector<1x128xbf16> to vector<1x128xf32>
    %cst_63 = arith.constant dense<0.000000e+00> : vector<8x128xf32>
    %151 = tpu.matmul %145, %147, %cst_63 {dimension_numbers = #tpu.dot_dimension_numbers<[1], [0], [0], [1], [0, 0, 1, 1], [], []>} : vector<8x128xbf16>, vector<128x128xbf16>, vector<8x128xf32> -> vector<8x128xf32>
    %152 = vector.broadcast %150 : vector<1x128xf32> to vector<8x128xf32>
    %153 = arith.addf %151, %152 : vector<8x128xf32>
    %c0_64 = arith.constant 0 : index
    %c0_65 = arith.constant 0 : index
    %154 = vector.load %arg2[%c0_64, %c0_65] : memref<8x128xf32, #tpu.memory_space<vmem>>, vector<8x128xf32>
    tpu.vector_store %arg2[%c0_64, %c0_65], %153 {strides = array<i32>} : memref<8x128xf32, #tpu.memory_space<vmem>>, vector<8x128xf32>,
    return
  }
}

</mosaic_0001>

<bundles_post_ra>
// kernel: _qnet_forward_jit.1
= control target key start
LH: loop header
LB: loop body
LE: loop exit
PB: predicated region body
PF: predicated region fallthrough
CT: control target
= control target key end

     0   :  { %7 = vsyncpa [#allocation3], 0  ;;  %s971_s9 = smov [#allocation2]   ;;  %s1066_s0 = inlined_call_operand.vmem [shape: f32[8,128], index: 0, kind: input, shape index: {}]   ;;  %s1067_s1 = inlined_call_operand.hbm [shape: bf16[5,136,128], index: 1, kind: input, shape index: {}]   ;;  %s1068_s2 = inlined_call_operand.vmem [shape: f32[8,128], index: 2, kind: output, shape index: {}]  }
   0x1   :  { %s15_s10 = sshll.u32 %s971_s9, 4  ;;  %s947_s13 = scalar_lea.hbm %s1067_s1, 5440  ;;  %s16_s10 = int_to_ptr.vmem [resolvable:$true] %s15_s10 }
   0x2   :  { %p948_p0 = scmp.ne.s32.totalorder %s1067_s1, %s947_s13  ;;  %p951_p1 = scmp.lt.u32.totalorder %s947_s13, %s1067_s1 }
   0x4   :  { %p953_p2 = pnand %p951_p1, %p948_p0 }
   0x6   :  { %956 = shalt.err (!%p953_p2)
}
   0x7   :  { %s957_s18 = scalar_lea.vmem %s16_s10, 5440  ;;  %p962_p4 = scmp.lt.s32.totalorder %s16_s10, %s16_s10 }
   0x8   :  { %p958_p3 = scmp.ne.s32.totalorder %s16_s10, %s957_s18  ;;  %p963_p5 = scmp.lt.s32.totalorder %s957_s18, %s957_s18 }
   0xa   :  { %p964_p6 = por %p963_p5, %p962_p4 }
   0xc   :  { %p965_p7 = pnand %p964_p6, %p958_p3 }
   0xe   :  { %968 = shalt.err (!%p965_p7)
}
   0xf   :  { %s972_s19 = smov 64   ;;  %s973_s20 = smov 4  }
  0x10   :  { %21 = dma.hbm_to_vmem [thread:$0]  %s1067_s1, 5440, %s16_s10, [#allocation3], %s972_s19, %s972_s19, %s973_s20  }
  0x11   :  { %969 = dma.done.wait [#allocation3], 5440  }
  0x12   :  { %970 = vsyncadd [#allocation3], 4294961856  ;;  %v974_v0 = vmov 0.0   ;;  %vm975_vm0 = vmmov 0   ;;  %v897_v1 = vld [vmem:[#allocation2] sm:$0xff]   ;;  %v898_v2 = vld [vmem:[#allocation2 + $0x8] sm:$0xff]   ;;  %v69_v41 = vlaneseq }
  0x13   :  { %792 = vmatprep.subr.bf16.mxu0 %v974_v0  ;;  %808 = vmatprep.mubr.msk.bf16.mxu0 %vm975_vm0, %v974_v0  ;;  %v899_v3 = vld [vmem:[#allocation2 + $0x10] sm:$0xff]   ;;  %v26_v4 = vld [vmem:[%s1066_s0] sm:$0xff]  ;;  %v900_v5 = vld [vmem:[#allocation2 + $0x18] sm:$0xff]  }
  0x14   :  { %812 = vmatprep.subr.bf16.mxu1 %v974_v0  ;;  %828 = vmatprep.mubr.msk.bf16.mxu1 %vm975_vm0, %v974_v0  ;;  %v27_v6 = vrot.slane %v26_v4, 4  ;;  %v35_v7 = vmul.f32 %v26_v4, %v26_v4  ;;  %v901_v10 = vld [vmem:[#allocation2 + $0x20] sm:$0xff]   ;;  %v902_v15 = vld [vmem:[#allocation2 + $0x28] sm:$0xff]   ;;  %v903_v20 = vld [vmem:[#allocation2 + $0x30] sm:$0xff]   ;;  %v70_v42 = vshrl.u32 %v69_v41, 7 }
  0x15   :  { %793 = vmatpush3.bf16.msra.mxu0 %v897_v1  ;;  %v904_v25 = vld [vmem:[#allocation2 + $0x38] sm:$0xff]   ;;  %v905_v33 = vld [vmem:[#allocation2 + $0x44] sm:$0xff]   ;;  %v906_v34 = vld [vmem:[#allocation2 + $0x4c] sm:$0xff]  }
  0x16   :  { %794 = vmatprep.subr.bf16.mxu0 %v974_v0  ;;  %v28_v8 = vadd.f32 %v27_v6, %v26_v4  ;;  %v36_v9 = vrot.slane %v35_v7, 4  ;;  %813 = vmatpush3.bf16.msra.mxu1 %v905_v33  ;;  %v907_v35 = vld [vmem:[#allocation2 + $0x54] sm:$0xff]   ;;  %v908_v36 = vld [vmem:[#allocation2 + $0x5c] sm:$0xff]   ;;  %v909_v37 = vld [vmem:[#allocation2 + $0x64] sm:$0xff]   ;;  %v1030_v45 = vsub.s32 0, %v70_v42 }
  0x17   :  { %814 = vmatprep.subr.bf16.mxu1 %v974_v0  ;;  %v910_v38 = vld [vmem:[#allocation2 + $0x6c] sm:$0xff]   ;;  %v911_v39 = vld [vmem:[#allocation2 + $0x74] sm:$0xff]   ;;  %v912_v40 = vld [vmem:[#allocation2 + $0x7c] sm:$0xff]  }
  0x18   :  { %v29_v11 = vrot.slane %v28_v8, 2  ;;  %v37_v12 = vadd.f32 %v36_v9, %v35_v7  ;;  %v67_v43 = vld [vmem:[#allocation2 + $0x40] sm:$0x1] }
  0x19   :  { %795 = vmatpush3.bf16.msra.mxu0 %v898_v2  ;;  %v68_v44 = vunpack.c.l.bf16 %v67_v43 }
  0x1a   :  { %796 = vmatprep.subr.bf16.mxu0 %v974_v0  ;;  %v30_v13 = vadd.f32 %v29_v11, %v28_v8  ;;  %v38_v14 = vrot.slane %v37_v12, 2  ;;  %815 = vmatpush3.bf16.msra.mxu1 %v906_v34 }
  0x1b   :  { %816 = vmatprep.subr.bf16.mxu1 %v974_v0  ;;  %v72_v46 = vrot.slane %v68_v44, %v1030_v45 }
  0x1c   :  { %v31_v16 = vrot.slane %v30_v13, 1  ;;  %v39_v17 = vadd.f32 %v38_v14, %v37_v12  ;;  %v914_v14 = vld [vmem:[#allocation2 + $0x90] sm:$0xff]  }
  0x1d   :  { %797 = vmatpush3.bf16.msra.mxu0 %v899_v3 }
  0x1e   :  { %798 = vmatprep.subr.bf16.mxu0 %v974_v0  ;;  %v32_v18 = vadd.f32 %v31_v16, %v30_v13  ;;  %v40_v19 = vrot.slane %v39_v17, 1  ;;  %817 = vmatpush3.bf16.msra.mxu1 %v907_v35  ;;  %v913_v13 = vld [vmem:[#allocation2 + $0x88] sm:$0xff]   ;;  %v916_v16 = vld [vmem:[#allocation2 + $0xa0] sm:$0xff]  }
  0x1f   :  { %818 = vmatprep.subr.bf16.mxu1 %v974_v0 }
  0x20   :  { %v34_v21 = vmul.f32 0.125, %v32_v18  ;;  %v41_v22 = vadd.f32 %v40_v19, %v39_v17  ;;  %v917_v17 = vld [vmem:[#allocation2 + $0xa8] sm:$0xff]   ;;  %v918_v18 = vld [vmem:[#allocation2 + $0xb0] sm:$0xff]   ;;  %v919_v19 = vld [vmem:[#allocation2 + $0xb8] sm:$0xff]  }
  0x21   :  { %799 = vmatpush3.bf16.msra.mxu0 %v900_v5 }
  0x22   :  { %800 = vmatprep.subr.bf16.mxu0 %v974_v0  ;;  %v42_v23 = vmul.f32 0.125, %v41_v22  ;;  %v43_v24 = vmul.f32 %v34_v21, %v34_v21  ;;  %v46_v29 = vsub.f32 %v26_v4, %v34_v21  ;;  %819 = vmatpush3.bf16.msra.mxu1 %v908_v36  ;;  %v202_v21 = vld [vmem:[#allocation2 + $0x84] sm:$0x1] }
  0x23   :  { %820 = vmatprep.subr.bf16.mxu1 %v974_v0  ;;  %v203_v22 = vunpack.c.l.bf16 %v202_v21 }
  0x24   :  { %v44_v26 = vsub.f32 %v42_v23, %v43_v24 }
  0x25   :  { %801 = vmatpush3.bf16.msra.mxu0 %v901_v10  ;;  %v207_v23 = vrot.slane %v203_v22, %v1030_v45 }
  0x26   :  { %802 = vmatprep.subr.bf16.mxu0 %v974_v0  ;;  %v45_v27 = vmax.f32 %v44_v26, 0.0  ;;  %821 = vmatpush3.bf16.msra.mxu1 %v909_v37 }
  0x27   :  { %822 = vmatprep.subr.bf16.mxu1 %v974_v0 }
  0x28   :  { %v47_v28 = vadd.f32 1e-05, %v45_v27 }
  0x29   :  { %803 = vmatpush3.bf16.msra.mxu0 %v902_v15  ;;  %v915_v15 = vld [vmem:[#allocation2 + $0x98] sm:$0xff]  }
  0x2a   :  { %804 = vmatprep.subr.bf16.mxu0 %v974_v0  ;;  %937 = vrsqrt.f32 %v47_v28  ;;  %823 = vmatpush3.bf16.msra.mxu1 %v910_v38 }
  0x2b   :  { %824 = vmatprep.subr.bf16.mxu1 %v974_v0 }
  0x2d   :  { %805 = vmatpush3.bf16.msra.mxu0 %v903_v20  ;;  %v920_v20 = vld [vmem:[#allocation2 + $0xc0] sm:$0xff]  }
  0x2e   :  { %806 = vmatprep.subr.bf16.mxu0 %v974_v0  ;;  %825 = vmatpush3.bf16.msra.mxu1 %v911_v39 }
  0x2f   :  { %826 = vmatprep.subr.bf16.mxu1 %v974_v0 }
  0x31   :  { %807 = vmatpush3.bf16.msra.mxu0 %v904_v25 }
  0x32   :  { %832 = vmatprep.subr.bf16.mxu0 %v974_v0  ;;  %827 = vmatpush3.bf16.msra.mxu1 %v912_v40 }
  0x33   :  { %852 = vmatprep.subr.bf16.mxu1 %v974_v0 }
  0x34   :  { %v938_v30 = vpop.eup %937 }
  0x35   :  { %v49_v31 = vmul.f32 %v938_v30, %v46_v29 }
  0x37   :  { %v50_v32 = vpack.c.bf16 %v49_v31, %v49_v31 }
  0x39   :  { %809 = vmatmul.mubr.bf16.vlgmr.msra.gmra.mrb[0].mxu0 %v50_v32 }
  0x3a   :  { %848 = vmatprep.mubr.msk.bf16.mxu0 %vm975_vm0, %v974_v0  ;;  %833 = vmatpush3.bf16.msra.mxu0 %v913_v13 }
  0x3b   :  { %834 = vmatprep.subr.bf16.mxu0 %v974_v0 }
  0x3e   :  { %835 = vmatpush3.bf16.msra.mxu0 %v914_v14 }
  0x3f   :  { %836 = vmatprep.subr.bf16.mxu0 %v974_v0 }
  0x42   :  { %837 = vmatpush3.bf16.msra.mxu0 %v915_v15 }
  0x43   :  { %838 = vmatprep.subr.bf16.mxu0 %v974_v0 }
  0x46   :  { %839 = vmatpush3.bf16.msra.mxu0 %v916_v16 }
  0x47   :  { %840 = vmatprep.subr.bf16.mxu0 %v974_v0 }
  0x4a   :  { %841 = vmatpush3.bf16.msra.mxu0 %v917_v17 }
  0x4b   :  { %842 = vmatprep.subr.bf16.mxu0 %v974_v0 }
  0x4e   :  { %843 = vmatpush3.bf16.msra.mxu0 %v918_v18 }
  0x4f   :  { %844 = vmatprep.subr.bf16.mxu0 %v974_v0 }
  0x52   :  { %845 = vmatpush3.bf16.msra.mxu0 %v919_v19 }
  0x53   :  { %846 = vmatprep.subr.bf16.mxu0 %v974_v0 }
  0x56   :  { %847 = vmatpush3.bf16.msra.mxu0 %v920_v20 }
  0x57   :  { %872 = vmatprep.subr.bf16.mxu0 %v974_v0 }
 0x10c   :  { %v155_v47 = vpop.f32.mrb[0].mxu0 }
 0x10d   :  { %v156_v48 = vadd.f32 %v155_v47, %v72_v46  ;;  %v810_v49 = vpop.f32.mrb[1].mxu0 }
 0x10e   :  { %v158_v50 = vpop.f32.mrb[2].mxu0 }
 0x10f   :  { %v161_v51 = vmax.f32 %v156_v48, 0.0  ;;  %v811_v52 = vpop.f32.mrb[3].mxu0 }
 0x111   :  { %v162_v53 = vrot.slane %v161_v51, 4  ;;  %v169_v54 = vmul.f32 %v161_v51, %v161_v51 }
 0x113   :  { %v163_v55 = vadd.f32 %v162_v53, %v161_v51  ;;  %v170_v56 = vrot.slane %v169_v54, 4 }
 0x115   :  { %v164_v57 = vrot.slane %v163_v55, 2  ;;  %v171_v58 = vadd.f32 %v170_v56, %v169_v54  ;;  %v921_v54 = vld [vmem:[#allocation2 + $0xcc] sm:$0xff]   ;;  %v923_v56 = vld [vmem:[#allocation2 + $0xdc] sm:$0xff]  }
 0x117   :  { %v172_v59 = vrot.slane %v171_v58, 2  ;;  %v165_v60 = vadd.f32 %v164_v57, %v163_v55  ;;  %v922_v55 = vld [vmem:[#allocation2 + $0xd4] sm:$0xff]   ;;  %v924_v57 = vld [vmem:[#allocation2 + $0xe4] sm:$0xff]  }
 0x119   :  { %v173_v61 = vadd.f32 %v172_v59, %v171_v58  ;;  %v166_v62 = vrot.slane %v165_v60, 1  ;;  %v925_v58 = vld [vmem:[#allocation2 + $0xec] sm:$0xff]   ;;  %v926_v59 = vld [vmem:[#allocation2 + $0xf4] sm:$0xff]  }
 0x11b   :  { %v174_v63 = vrot.slane %v173_v61, 1  ;;  %v167_v1 = vadd.f32 %v166_v62, %v165_v60  ;;  %v927_v60 = vld [vmem:[#allocation2 + $0xfc] sm:$0xff]   ;;  %v337_v62 = vld [vmem:[#allocation2 + $0xc8] sm:$0x1] }
 0x11d   :  { %v168_v2 = vmul.f32 0.125, %v167_v1  ;;  %v175_v3 = vadd.f32 %v174_v63, %v173_v61  ;;  %v928_v61 = vld [vmem:[#allocation2 + $0x104] sm:$0xff]   ;;  %v338_v63 = vunpack.c.l.bf16 %v337_v62 }
 0x11f   :  { %v176_v4 = vmul.f32 0.125, %v175_v3  ;;  %v177_v5 = vmul.f32 %v168_v2, %v168_v2  ;;  %v180_v9 = vsub.f32 %v161_v51, %v168_v2  ;;  %v342_v1 = vrot.slane %v338_v63, %v1030_v45 }
 0x121   :  { %v178_v6 = vsub.f32 %v176_v4, %v177_v5 }
 0x123   :  { %v179_v7 = vmax.f32 %v178_v6, 0.0 }
 0x125   :  { %v181_v8 = vadd.f32 1e-05, %v179_v7 }
 0x127   :  { %939 = vrsqrt.f32 %v181_v8 }
 0x131   :  { %v940_v10 = vpop.eup %939 }
 0x132   :  { %v183_v11 = vmul.f32 %v940_v10, %v180_v9 }
 0x134   :  { %v184_v12 = vpack.c.bf16 %v183_v11, %v183_v11 }
 0x136   :  { %829 = vmatmul.mubr.bf16.vlgmr.msra.gmra.mrb[0].mxu1 %v184_v12 }
 0x137   :  { %868 = vmatprep.mubr.msk.bf16.mxu1 %vm975_vm0, %v974_v0  ;;  %853 = vmatpush3.bf16.msra.mxu1 %v921_v54 }
 0x138   :  { %854 = vmatprep.subr.bf16.mxu1 %v974_v0 }
 0x13b   :  { %855 = vmatpush3.bf16.msra.mxu1 %v922_v55 }
 0x13c   :  { %856 = vmatprep.subr.bf16.mxu1 %v974_v0 }
 0x13f   :  { %857 = vmatpush3.bf16.msra.mxu1 %v923_v56 }
 0x140   :  { %858 = vmatprep.subr.bf16.mxu1 %v974_v0 }
 0x143   :  { %859 = vmatpush3.bf16.msra.mxu1 %v924_v57 }
 0x144   :  { %860 = vmatprep.subr.bf16.mxu1 %v974_v0 }
 0x147   :  { %861 = vmatpush3.bf16.msra.mxu1 %v925_v58 }
 0x148   :  { %862 = vmatprep.subr.bf16.mxu1 %v974_v0 }
 0x14b   :  { %863 = vmatpush3.bf16.msra.mxu1 %v926_v59 }
 0x14c   :  { %864 = vmatprep.subr.bf16.mxu1 %v974_v0 }
 0x14f   :  { %865 = vmatpush3.bf16.msra.mxu1 %v927_v60 }
 0x150   :  { %866 = vmatprep.subr.bf16.mxu1 %v974_v0 }
 0x153   :  { %867 = vmatpush3.bf16.msra.mxu1 %v928_v61 }
 0x209   :  { %v290_v24 = vpop.f32.mrb[0].mxu1 }
 0x20a   :  { %v291_v25 = vadd.f32 %v290_v24, %v207_v23  ;;  %v830_v26 = vpop.f32.mrb[1].mxu1 }
 0x20b   :  { %v293_v27 = vpop.f32.mrb[2].mxu1 }
 0x20c   :  { %v296_v28 = vmax.f32 %v291_v25, 0.0  ;;  %v831_v29 = vpop.f32.mrb[3].mxu1 }
 0x20e   :  { %v297_v30 = vrot.slane %v296_v28, 4  ;;  %v304_v31 = vmul.f32 %v296_v28, %v296_v28 }
 0x210   :  { %v298_v32 = vadd.f32 %v297_v30, %v296_v28  ;;  %v305_v33 = vrot.slane %v304_v31, 4 }
 0x212   :  { %v299_v34 = vrot.slane %v298_v32, 2  ;;  %v306_v35 = vadd.f32 %v305_v33, %v304_v31  ;;  %v929_v31 = vld [vmem:[#allocation2 + $0x110] sm:$0xff]   ;;  %v931_v33 = vld [vmem:[#allocation2 + $0x120] sm:$0xff]  }
 0x214   :  { %v300_v36 = vadd.f32 %v299_v34, %v298_v32  ;;  %v307_v37 = vrot.slane %v306_v35, 2  ;;  %v930_v32 = vld [vmem:[#allocation2 + $0x118] sm:$0xff]   ;;  %v932_v34 = vld [vmem:[#allocation2 + $0x128] sm:$0xff]  }
 0x216   :  { %v301_v38 = vrot.slane %v300_v36, 1  ;;  %v308_v39 = vadd.f32 %v307_v37, %v306_v35  ;;  %v933_v35 = vld [vmem:[#allocation2 + $0x130] sm:$0xff]   ;;  %v935_v37 = vld [vmem:[#allocation2 + $0x140] sm:$0xff]  }
 0x218   :  { %v302_v40 = vadd.f32 %v301_v38, %v300_v36  ;;  %v309_v41 = vrot.slane %v308_v39, 1  ;;  %v934_v36 = vld [vmem:[#allocation2 + $0x138] sm:$0xff]   ;;  %v936_v38 = vld [vmem:[#allocation2 + $0x148] sm:$0xff]  }
 0x21a   :  { %v303_v42 = vmul.f32 0.125, %v302_v40  ;;  %v310_v43 = vadd.f32 %v309_v41, %v308_v39  ;;  %v472_v39 = vld [vmem:[#allocation2 + $0x10c] sm:$0x1] }
 0x21b   :  { %v473_v40 = vunpack.c.l.bf16 %v472_v39 }
 0x21c   :  { %v311_v44 = vmul.f32 0.125, %v310_v43  ;;  %v312_v46 = vmul.f32 %v303_v42, %v303_v42  ;;  %v315_v50 = vsub.f32 %v296_v28, %v303_v42 }
 0x21d   :  { %v477_v41 = vrot.slane %v473_v40, %v1030_v45 }
 0x21e   :  { %v313_v47 = vsub.f32 %v311_v44, %v312_v46 }
 0x220   :  { %v314_v48 = vmax.f32 %v313_v47, 0.0 }
 0x222   :  { %v316_v49 = vadd.f32 1e-05, %v314_v48 }
 0x224   :  { %941 = vrsqrt.f32 %v316_v49 }
 0x22e   :  { %v942_v51 = vpop.eup %941 }
 0x22f   :  { %v318_v52 = vmul.f32 %v942_v51, %v315_v50 }
 0x231   :  { %v319_v53 = vpack.c.bf16 %v318_v52, %v318_v52 }
 0x233   :  { %849 = vmatmul.mubr.bf16.vlgmr.msra.gmra.mrb[4].mxu0 %v319_v53 }
 0x234   :  { %888 = vmatprep.mubr.msk.bf16.mxu0 %vm975_vm0, %v974_v0  ;;  %873 = vmatpush3.bf16.msra.mxu0 %v929_v31 }
 0x235   :  { %874 = vmatprep.subr.bf16.mxu0 %v974_v0 }
 0x238   :  { %875 = vmatpush3.bf16.msra.mxu0 %v930_v32 }
 0x239   :  { %876 = vmatprep.subr.bf16.mxu0 %v974_v0 }
 0x23c   :  { %877 = vmatpush3.bf16.msra.mxu0 %v931_v33 }
 0x23d   :  { %878 = vmatprep.subr.bf16.mxu0 %v974_v0 }
 0x240   :  { %879 = vmatpush3.bf16.msra.mxu0 %v932_v34 }
 0x241   :  { %880 = vmatprep.subr.bf16.mxu0 %v974_v0 }
 0x244   :  { %881 = vmatpush3.bf16.msra.mxu0 %v933_v35 }
 0x245   :  { %882 = vmatprep.subr.bf16.mxu0 %v974_v0 }
 0x248   :  { %883 = vmatpush3.bf16.msra.mxu0 %v934_v36 }
 0x249   :  { %884 = vmatprep.subr.bf16.mxu0 %v974_v0 }
 0x24c   :  { %885 = vmatpush3.bf16.msra.mxu0 %v935_v37 }
 0x24d   :  { %886 = vmatprep.subr.bf16.mxu0 %v974_v0 }
 0x250   :  { %887 = vmatpush3.bf16.msra.mxu0 %v936_v38 }
 0x306   :  { %v425_v2 = vpop.f32.mrb[4].mxu0 }
 0x307   :  { %v426_v3 = vadd.f32 %v425_v2, %v342_v1  ;;  %v850_v4 = vpop.f32.mrb[5].mxu0 }
 0x308   :  { %v428_v5 = vpop.f32.mrb[6].mxu0 }
 0x309   :  { %v431_v6 = vmax.f32 %v426_v3, 0.0  ;;  %v851_v7 = vpop.f32.mrb[7].mxu0 }
 0x30b   :  { %v432_v8 = vrot.slane %v431_v6, 4  ;;  %v439_v9 = vmul.f32 %v431_v6, %v431_v6 }
 0x30d   :  { %v433_v10 = vadd.f32 %v432_v8, %v431_v6  ;;  %v440_v11 = vrot.slane %v439_v9, 4  ;;  %v607_v8 = vld [vmem:[#allocation2 + $0x150] sm:$0x1] }
 0x30f   :  { %v434_v12 = vrot.slane %v433_v10, 2  ;;  %v441_v13 = vadd.f32 %v440_v11, %v439_v9  ;;  %v608_v9 = vunpack.c.l.bf16 %v607_v8 }
 0x311   :  { %v435_v14 = vadd.f32 %v434_v12, %v433_v10  ;;  %v442_v15 = vrot.slane %v441_v13, 2  ;;  %v612_v10 = vrot.slane %v608_v9, %v1030_v45 }
 0x313   :  { %v436_v16 = vrot.slane %v435_v14, 1  ;;  %v443_v17 = vadd.f32 %v442_v15, %v441_v13 }
 0x315   :  { %v437_v18 = vadd.f32 %v436_v16, %v435_v14  ;;  %v444_v19 = vrot.slane %v443_v17, 1 }
 0x317   :  { %v438_v20 = vmul.f32 0.125, %v437_v18  ;;  %v445_v21 = vadd.f32 %v444_v19, %v443_v17 }
 0x319   :  { %v446_v22 = vmul.f32 0.125, %v445_v21  ;;  %v447_v23 = vmul.f32 %v438_v20, %v438_v20  ;;  %v450_v27 = vsub.f32 %v431_v6, %v438_v20 }
 0x31b   :  { %v448_v24 = vsub.f32 %v446_v22, %v447_v23 }
 0x31d   :  { %v449_v25 = vmax.f32 %v448_v24, 0.0 }
 0x31f   :  { %v451_v26 = vadd.f32 1e-05, %v449_v25 }
 0x321   :  { %943 = vrsqrt.f32 %v451_v26 }
 0x32b   :  { %v944_v28 = vpop.eup %943 }
 0x32c   :  { %v453_v29 = vmul.f32 %v944_v28, %v450_v27 }
 0x32e   :  { %v454_v30 = vpack.c.bf16 %v453_v29, %v453_v29 }
 0x330   :  { %869 = vmatmul.mubr.bf16.vlgmr.msra.gmra.mrb[4].mxu1 %v454_v30 }
 0x403   :  { %v560_v42 = vpop.f32.mrb[4].mxu1 }
 0x404   :  { %v561_v43 = vadd.f32 %v560_v42, %v477_v41  ;;  %v870_v44 = vpop.f32.mrb[5].mxu1 }
 0x405   :  { %v563_v46 = vpop.f32.mrb[6].mxu1 }
 0x406   :  { %v566_v47 = vmax.f32 %v561_v43, 0.0  ;;  %v871_v48 = vpop.f32.mrb[7].mxu1 }
 0x408   :  { %v567_v49 = vrot.slane %v566_v47, 4  ;;  %v574_v50 = vmul.f32 %v566_v47, %v566_v47 }
 0x40a   :  { %v568_v51 = vadd.f32 %v567_v49, %v566_v47  ;;  %v575_v52 = vrot.slane %v574_v50, 4 }
 0x40c   :  { %v569_v53 = vrot.slane %v568_v51, 2  ;;  %v576_v54 = vadd.f32 %v575_v52, %v574_v50 }
 0x40e   :  { %v570_v55 = vadd.f32 %v569_v53, %v568_v51  ;;  %v577_v56 = vrot.slane %v576_v54, 2 }
 0x410   :  { %v571_v0 = vrot.slane %v570_v55, 1  ;;  %v578_v57 = vadd.f32 %v577_v56, %v576_v54 }
 0x412   :  { %v572_v58 = vadd.f32 %v571_v0, %v570_v55  ;;  %v579_v59 = vrot.slane %v578_v57, 1 }
 0x414   :  { %v573_v60 = vmul.f32 0.125, %v572_v58  ;;  %v580_v61 = vadd.f32 %v579_v59, %v578_v57 }
 0x416   :  { %v581_v62 = vmul.f32 0.125, %v580_v61  ;;  %v582_v63 = vmul.f32 %v573_v60, %v573_v60  ;;  %v585_v4 = vsub.f32 %v566_v47, %v573_v60 }
 0x418   :  { %v583_v1 = vsub.f32 %v581_v62, %v582_v63 }
 0x41a   :  { %v584_v2 = vmax.f32 %v583_v1, 0.0 }
 0x41c   :  { %v586_v3 = vadd.f32 1e-05, %v584_v2 }
 0x41e   :  { %945 = vrsqrt.f32 %v586_v3 }
 0x428   :  { %v946_v5 = vpop.eup %945 }
 0x429   :  { %v588_v6 = vmul.f32 %v946_v5, %v585_v4 }
 0x42b   :  { %v589_v7 = vpack.c.bf16 %v588_v6, %v588_v6 }
 0x42d   :  { %889 = vmatmul.mubr.bf16.vlgmr.msra.gmra.mrb[8].mxu0 %v589_v7 }
 0x500   :  { %v695_v11 = vpop.f32.mrb[8].mxu0 }
 0x501   :  { %v696_v12 = vadd.f32 %v695_v11, %v612_v10  ;;  %v890_v13 = vpop.f32.mrb[9].mxu0 }
 0x502   :  { %v698_v14 = vpop.f32.mrb[10].mxu0 }
 0x503   :  { %701 = vst [vmem:[%s1068_s2] sm:$0xff] %v696_v12  ;;  %v891_v15 = vpop.f32.mrb[11].mxu0 }
 0x504   :  { %706 = vsyncpa [#allocation3], 1 }

</bundles_post_ra>
